<compile_context>
chip_gen: v6e
topology: v6e:2x2x1
jax: 0.10.0
libtpu: 0.0.40
codegen_flags: <defaults>
</compile_context>

<pallas_src>
import jax
import jax.numpy as jnp
from jax.experimental import pallas as pl
from jax.experimental.pallas import tpu as pltpu


def _round_up(x, m):
    return ((x + m - 1) // m) * m


# -------------------- kernels --------------------

def _simple_kernel(x_ref, w_ref, b4_ref, o_ref):
    """x:(tb,4), w:(1,E), b4:(1,E) -> o:(tb,E). VPU broadcast FMA."""
    x = x_ref[...]
    s = x[:, 0:1] + x[:, 1:2] + x[:, 2:3] + x[:, 3:4]          # (tb, 1)
    o_ref[...] = s * w_ref[...] + b4_ref[...]


def _fold_kernel(x_ref, m_ref, bf_ref, o_ref):
    """Lane-dense variant for E < 128 (k = 128 // E rows folded per output row).

    x : (tbg, 4k)  -- k original batch rows folded per kernel row
    m : (4k, 128)  -- block-diagonal: M[c, l] = w[l % E] if c//4 == l//E else 0
    bf: (1, 128)   -- (4*b) tiled k times along lanes
    o : (tbg, 128) -- lane-dense output -> full unmasked stores

    One tiny MXU matmul performs the 4-column sum, the weight scale and the
    lane scatter at once (replaces the old XLU-heavy per-j broadcast loop).
    """
    o_ref[...] = (
        jnp.dot(x_ref[...], m_ref[...],
                preferred_element_type=jnp.float32,
                precision=jax.lax.Precision.HIGHEST)
        + bf_ref[...]
    )


# -------------------- tiling helpers --------------------

_VMEM_BUDGET = 20 << 20      # double-buffered in+out blocks; safe on v7x (64 MiB phys)
_MAX_BLOCK_ROWS = 8192       # upper tile bound


def _pick_tile(rows, out_lanes):
    """Rows per grid step.

    Big tiles (>= ~1k rows) amortize per-step pipeline overhead, capped so
    (a) double-buffered input (lane-padded to 128) + output blocks fit the
    VMEM budget, and (b) large batches keep >= 4 grid steps so the parallel
    axis can shard across v7x's two TensorCores.
    """
    per_row_bytes = 2 * (128 + out_lanes) * 4          # x2 = double buffering
    vmem_rows = max(8, (_VMEM_BUDGET // per_row_bytes) // 8 * 8)
    cap = min(_MAX_BLOCK_ROWS, vmem_rows)
    t = min(cap, max(1024, _round_up(pl.cdiv(rows, 4), 8)))
    return max(8, min(t, _round_up(rows, 8)))


def _compiler_params(tile_rows, out_lanes):
    vmem_bytes = 2 * tile_rows * (128 + out_lanes) * 4 + (2 << 20)  # + consts margin
    return pltpu.CompilerParams(
        dimension_semantics=("parallel",),
        vmem_limit_bytes=int(min(max(vmem_bytes, 4 << 20), 48 << 20)),
    )


# -------------------- wrapper --------------------

def temporal_feature_encoder(temporal_features, day_w, day_b):
    """temporal_features: (B, 4); day_w: (E, 1); day_b: (E,) -> (B, E) f32."""
    x = temporal_features.astype(jnp.float32)
    B = x.shape[0]
    E = day_w.shape[0]
    w_row = day_w.reshape(1, E).astype(jnp.float32)             # (1, E) = W.T
    b4_row = (4.0 * day_b).reshape(1, E).astype(jnp.float32)    # fold the 4 bias adds

    use_fold = (E < 128) and (128 % E == 0) and (128 // E <= 32)
    if use_fold:
        # Fold k batch rows into one 128-lane output row -> unmasked full stores.
        k = 128 // E
        bp = _round_up(B, k)                                    # pad only to k
        x_p = x if bp == B else jnp.pad(x, ((0, bp - B), (0, 0)))
        bg = bp // k
        xf = x_p.reshape(bg, 4 * k)                             # contiguous: free reshape
        # Block-diagonal (4k, 128) weight: each (4, E) diagonal block is W.T
        # repeated 4 times (one copy per temporal column).
        m = jnp.kron(jnp.eye(k, dtype=jnp.float32), jnp.tile(w_row, (4, 1)))
        bf = jnp.tile(b4_row, (1, k))                           # (1, 128)
        tbg = _pick_tile(bg, 128)
        out_f = pl.pallas_call(
            _fold_kernel,
            out_shape=jax.ShapeDtypeStruct((bg, 128), jnp.float32),  # un-padded
            grid=(pl.cdiv(bg, tbg),),                           # ragged last block OK
            in_specs=[
                pl.BlockSpec((tbg, 4 * k), lambda i: (i, 0)),
                pl.BlockSpec((4 * k, 128), lambda i: (0, 0)),
                pl.BlockSpec((1, 128), lambda i: (0, 0)),
            ],
            out_specs=pl.BlockSpec((tbg, 128), lambda i: (i, 0)),
            compiler_params=_compiler_params(tbg, 128),
        )(xf, m, bf)
        out = out_f.reshape(bp, E)                              # free (contiguous) reshape
        return out if bp == B else out[:B]

    # Simple path (E a multiple of 128, or irregular E: correct but masked stores).
    out_lanes = _round_up(E, 128)
    tb = _pick_tile(B, out_lanes)
    return pl.pallas_call(
        _simple_kernel,
        out_shape=jax.ShapeDtypeStruct((B, E), jnp.float32),    # un-padded: no [:B] copy
        grid=(pl.cdiv(B, tb),),                                 # ragged last block OK
        in_specs=[
            pl.BlockSpec((tb, 4), lambda i: (i, 0)),
            pl.BlockSpec((1, E), lambda i: (0, 0)),
            pl.BlockSpec((1, E), lambda i: (0, 0)),
        ],
        out_specs=pl.BlockSpec((tb, E), lambda i: (i, 0)),
        compiler_params=_compiler_params(tb, out_lanes),
    )(x, w_row, b4_row)


if __name__ == "__main__":
    keys = jax.random.split(jax.random.PRNGKey(0), 8)
    B, E = 8, 32

    # Parameters of nn.Linear(1, E) (only day_embedding is used by forward).
    day_w = jax.random.normal(keys[0], (E, 1), jnp.float32) * 0.1
    day_b = jax.random.normal(keys[1], (E,), jnp.float32) * 0.1
    temporal_features = jax.random.normal(keys[2], (B, 4), jnp.float32)

    # Pure-JAX elementwise reference of the PyTorch forward (eval mode).
    def ref(x, w, b):
        w_row = w.reshape(1, -1)
        out = jnp.zeros((x.shape[0], w.shape[0]), jnp.float32)
        for c in range(4):
            out = out + (x[:, c:c + 1] * w_row + b[None, :])
        return out

    # Fold (lane-dense, MXU) path: E=32 < 128, B multiple of k.
    out = jax.block_until_ready(temporal_feature_encoder(temporal_features, day_w, day_b))
    assert out.shape == (B, E)
    assert jnp.allclose(out, ref(temporal_features, day_w, day_b), atol=1e-4, rtol=1e-4)

    # Fold path with B not a multiple of k (exercises pad-to-k + tail slice).
    x3 = jax.random.normal(keys[3], (7, 4), jnp.float32)
    out3 = jax.block_until_ready(temporal_feature_encoder(x3, day_w, day_b))
    assert out3.shape == (7, E)
    assert jnp.allclose(out3, ref(x3, day_w, day_b), atol=1e-4, rtol=1e-4)

    # Simple (VPU) path: E=128, odd batch exercises the ragged last grid block.
    B2, E2 = 10, 128
    x2 = jax.random.normal(keys[4], (B2, 4), jnp.float32)
    w2 = jax.random.normal(keys[5], (E2, 1), jnp.float32) * 0.1
    b2 = jax.random.normal(keys[6], (E2,), jnp.float32) * 0.1
    out2 = jax.block_until_ready(temporal_feature_encoder(x2, w2, b2))
    assert out2.shape == (B2, E2)
    assert jnp.allclose(out2, ref(x2, w2, b2), atol=1e-4, rtol=1e-4)

    print("KERNEL_OK")
</pallas_src>

<mosaic_0001>
module attributes {stable_mosaic.version = 11 : i64} {
  func.func @_fold_kernel(%arg0: i32, %arg1: memref<8x16xf32, #tpu.memory_space<vmem>>, %arg2: memref<16x128xf32, #tpu.memory_space<vmem>>, %arg3: memref<1x128xf32, #tpu.memory_space<vmem>>, %arg4: memref<8x128xf32, #tpu.memory_space<vmem>>) attributes {dimension_semantics = [#tpu.dimension_semantics<parallel>], iteration_bounds = array<i64: 1>, scalar_prefetch = 0 : i64, scratch_operands = 0 : i64, tpu.core_type = #tpu.core_type<tc>, window_params = [{transform_indices = @transform_0, window_bounds = array<i64: 8, 16>}, {pipeline_mode = #tpu.pipeline_mode<synchronous>, transform_indices = @transform_1, window_bounds = array<i64: 16, 128>}, {pipeline_mode = #tpu.pipeline_mode<synchronous>, transform_indices = @transform_2, window_bounds = array<i64: 1, 128>}, {transform_indices = @transform_3, window_bounds = array<i64: 8, 128>}]} {
    %c0 = arith.constant 0 : index
    %c0_0 = arith.constant 0 : index
    %0 = vector.load %arg1[%c0, %c0_0] : memref<8x16xf32, #tpu.memory_space<vmem>>, vector<8x16xf32>
    %c0_1 = arith.constant 0 : index
    %c0_2 = arith.constant 0 : index
    %1 = vector.load %arg2[%c0_1, %c0_2] : memref<16x128xf32, #tpu.memory_space<vmem>>, vector<16x128xf32>
    %cst = arith.constant dense<0.000000e+00> : vector<8x128xf32>
    %2 = tpu.matmul %0, %1, %cst {dimension_numbers = #tpu.dot_dimension_numbers<[1], [0], [0], [1], [0, 0, 1, 1], [], []>, precision = #tpu.contract_precision<fp32>} : vector<8x16xf32>, vector<16x128xf32>, vector<8x128xf32> -> vector<8x128xf32>
    %c0_3 = arith.constant 0 : index
    %c0_4 = arith.constant 0 : index
    %3 = vector.load %arg3[%c0_3, %c0_4] : memref<1x128xf32, #tpu.memory_space<vmem>>, vector<1x128xf32>
    %4 = vector.broadcast %3 : vector<1x128xf32> to vector<8x128xf32>
    %5 = arith.addf %2, %4 : vector<8x128xf32>
    %c0_5 = arith.constant 0 : index
    %c0_6 = arith.constant 0 : index
    %6 = vector.load %arg4[%c0_5, %c0_6] : memref<8x128xf32, #tpu.memory_space<vmem>>, vector<8x128xf32>
    tpu.vector_store %arg4[%c0_5, %c0_6], %5 {strides = array<i32>} : memref<8x128xf32, #tpu.memory_space<vmem>>, vector<8x128xf32>,
    return
  }
  func.func @transform_0(%arg0: i32) -> (i32, i32) {
    %c0_i32 = arith.constant 0 : i32
    %c0_i32_0 = arith.constant 0 : i32
    return %arg0, %c0_i32 : i32, i32
  }
  func.func @transform_1(%arg0: i32) -> (i32, i32) {
    %c0_i32 = arith.constant 0 : i32
    %c0_i32_0 = arith.constant 0 : i32
    %c0_i32_1 = arith.constant 0 : i32
    return %c0_i32, %c0_i32_0 : i32, i32
  }
  func.func @transform_2(%arg0: i32) -> (i32, i32) {
    %c0_i32 = arith.constant 0 : i32
    %c0_i32_0 = arith.constant 0 : i32
    %c0_i32_1 = arith.constant 0 : i32
    return %c0_i32, %c0_i32_0 : i32, i32
  }
  func.func @transform_3(%arg0: i32) -> (i32, i32) {
    %c0_i32 = arith.constant 0 : i32
    %c0_i32_0 = arith.constant 0 : i32
    return %arg0, %c0_i32 : i32, i32
  }
}

</mosaic_0001>

<bundles_post_ra>
// kernel: tpu_custom_call.1
= control target key start
LH: loop header
LB: loop body
LE: loop exit
PB: predicated region body
PF: predicated region fallthrough
CT: control target
= control target key end

     0   :  { %8 = vsyncpa [#allocation3], 0  ;;  %s724_s0 = inlined_call_operand.hbm [shape: f32[2,16], index: 0, kind: input, shape index: {}]   ;;  %s725_s1 = inlined_call_operand.hbm [shape: f32[16,128], index: 1, kind: input, shape index: {}]   ;;  %s726_s2 = inlined_call_operand.vmem [shape: f32[1,128], index: 2, kind: input, shape index: {}]   ;;  %s727_s3 = inlined_call_operand.hbm [shape: f32[2,128], index: 3, kind: output, shape index: {}]  }
   0x1   :  { %9 = vsyncpa [#allocation6], 0 }
   0x2   :  { %10 = vsyncpa [#allocation4], 0 }
   0x3   :  { %15 = vsyncadd [#allocation3], 96  ;;  %s671_s12 = smov [#allocation2]  }
   0x4   :  { %s16_s13 = sshll.u32 %s671_s12, 4  ;;  %s17_s13 = int_to_ptr.vmem [resolvable:$true] %s16_s13 }
   0x5   :  { %s613_s14 = scalar_lea.vmem %s17_s13, 32  ;;  %s617_s15 = scalar_lea.vmem %s17_s13, 128 }
   0x6   :  { %p614_p0 = scmp.ne.s32.totalorder %s17_s13, %s613_s14  ;;  %p618_p1 = scmp.lt.s32.totalorder %s17_s13, %s17_s13 }
   0x7   :  { %p619_p2 = scmp.lt.s32.totalorder %s617_s15, %s613_s14 }
   0x9   :  { %p620_p3 = por %p619_p2, %p618_p1 }
   0xb   :  { %p621_p4 = pnand %p620_p3, %p614_p0 }
   0xd   :  { %624 = shalt.err (!%p621_p4)
}
   0xe   :  { %s672_s16 = smov 32   ;;  %s673_s17 = smov 2  }
   0xf   :  { %22 = dma.hbm_to_vmem [thread:$0]  %s724_s0, 32, %s17_s13, [#allocation3], %s672_s16, %s672_s16, %s673_s17  }
  0x10   :  { %s674_s20 = smov [#allocation5]  }
  0x11   :  { %s28_s21 = sshll.u32 %s674_s20, 4  ;;  %s29_s21 = int_to_ptr.vmem [resolvable:$true] %s28_s21 }
  0x12   :  { %s633_s22 = scalar_lea.vmem %s29_s21, 256  ;;  %p638_p6 = scmp.lt.s32.totalorder %s29_s21, %s29_s21 }
  0x13   :  { %p634_p5 = scmp.ne.s32.totalorder %s29_s21, %s633_s22  ;;  %p639_p7 = scmp.lt.s32.totalorder %s633_s22, %s633_s22 }
  0x15   :  { %p640_p8 = por %p639_p7, %p638_p6 }
  0x17   :  { %p641_p9 = pnand %p640_p8, %p634_p5 }
  0x19   :  { %644 = shalt.err (!%p641_p9)
}
  0x1a   :  { %s675_s23 = smov 128   ;;  %s676_s24 = smov 8  }
  0x1b   :  { %34 = dma.hbm_to_vmem [thread:$0]  %s725_s1, 256, %s29_s21, [#allocation6], %s675_s23, %s675_s23, %s676_s24  }
  0x1c   :  { %665 = dma.done.wait [#allocation3], 128  }
  0x1d   :  { %666 = vsyncadd [#allocation3], 4294967168 }
  0x1e   :  { %667 = dma.done.wait [#allocation6], 256  }
  0x1f   :  { %668 = vsyncadd [#allocation6], 4294967040  ;;  %v677_v0 = vmov 0.0   ;;  %vm678_vm0 = vmmov 0   ;;  %vm53_vm1 = vcmask 130048   ;;  %v45_v1 = vld [vmem:[#allocation5 + $0x8] sm:$0xff] }
  0x20   :  { %554 = vmatprep.subr.mxu0 %v677_v0  ;;  %561 = vmatprep.subr.mxu1 %v677_v0  ;;  %v44_v2 = vld [vmem:[#allocation5] sm:$0xff]  ;;  %v43_v3 = vld [vmem:[#allocation2] sm:$0xff]  ;;  %v86_v4 = vand.u32 4294901760, %v45_v1 }
  0x21   :  { %558 = vmatprep.mubr.msk.f32.mxu0 %vm678_vm0, %v677_v0  ;;  %565 = vmatprep.mubr.msk.f32.mxu1 %vm678_vm0, %v677_v0  ;;  %v89_v5 = vand.u32 4294901760, %v44_v2  ;;  %v55_v6 = vsel %vm53_vm1, %v43_v3, 0  ;;  %v535_v20 = vld [vmem:[%s726_s2] ss:$0 sm:$0xff] }
  0x22   :  { %v124_v7 = vand.u32 4294901760, %v55_v6  ;;  %555 = vmatpush3.msra.mxu0 %v86_v4  ;;  %v164_v8 = vsub.f32 %v45_v1, %v86_v4 }
  0x23   :  { %v171_v9 = vsub.f32 %v44_v2, %v89_v5  ;;  %556 = vmatprep.subr.mxu0 %v677_v0 }
  0x24   :  { %v125_v10 = vsub.f32 %v55_v6, %v124_v7  ;;  %557 = vmatpush3.msra.mxu0 %v89_v5  ;;  %v165_v11 = vand.u32 4294901760, %v164_v8 }
  0x25   :  { %v172_v12 = vand.u32 4294901760, %v171_v9  ;;  %568 = vmatprep.subr.mxu0 %v677_v0 }
  0x26   :  { %v126_v13 = vand.u32 4294901760, %v125_v10  ;;  %v166_v14 = vsub.f32 %v164_v8, %v165_v11 }
  0x27   :  { %v173_v15 = vsub.f32 %v171_v9, %v172_v12 }
  0x28   :  { %v127_v16 = vsub.f32 %v125_v10, %v126_v13  ;;  %v167_v17 = vand.u32 4294901760, %v166_v14 }
  0x29   :  { %v174_v18 = vand.u32 4294901760, %v173_v15 }
  0x2a   :  { %v128_v19 = vand.u32 4294901760, %v127_v16  ;;  %562 = vmatpush3.msra.mxu1 %v167_v17 }
  0x2b   :  { %563 = vmatprep.subr.mxu1 %v677_v0 }
  0x2c   :  { %559 = vmatmul.mubr.f32.vlgmr.msra.gmra.mxu0 %v128_v19  ;;  %564 = vmatpush3.msra.mxu1 %v174_v18 }
  0x2d   :  { %569 = vmatpush3.msra.mxu0 %v164_v8  ;;  %566 = vmatmul.mubr.f32.vlgmr.msra.gmra.mxu1 %v124_v7 }
  0x2e   :  { %570 = vmatprep.subr.mxu0 %v677_v0  ;;  %575 = vmatprep.subr.mxu1 %v677_v0 }
  0x2f   :  { %571 = vmatpush3.msra.mxu0 %v171_v9  ;;  %572 = vmatprep.mubr.msk.f32.mxu0 %vm678_vm0, %v677_v0 }
  0x30   :  { %576 = vmatpush3.msra.mxu1 %v86_v4  ;;  %573 = vmatmul.mubr.f32.vlgmr.msra.gmra.mxu0 %v125_v10 }
  0x31   :  { %577 = vmatprep.subr.mxu1 %v677_v0  ;;  %582 = vmatprep.subr.mxu0 %v677_v0 }
  0x32   :  { %578 = vmatpush3.msra.mxu1 %v89_v5  ;;  %579 = vmatprep.mubr.msk.f32.mxu1 %vm678_vm0, %v677_v0 }
  0x33   :  { %583 = vmatpush3.msra.mxu0 %v165_v11  ;;  %580 = vmatmul.mubr.f32.vlgmr.msra.gmra.mxu1 %v126_v13 }
  0x34   :  { %584 = vmatprep.subr.mxu0 %v677_v0  ;;  %589 = vmatprep.subr.mxu1 %v677_v0 }
  0x35   :  { %585 = vmatpush3.msra.mxu0 %v172_v12  ;;  %586 = vmatprep.mubr.msk.f32.mxu0 %vm678_vm0, %v677_v0 }
  0x36   :  { %590 = vmatpush3.msra.mxu1 %v86_v4  ;;  %587 = vmatmul.mubr.f32.vlgmr.msra.gmra.mxu0 %v124_v7 }
  0x37   :  { %591 = vmatprep.subr.mxu1 %v677_v0  ;;  %593 = vmatprep.mubr.msk.f32.mxu1 %vm678_vm0, %v677_v0 }
  0x38   :  { %592 = vmatpush3.msra.mxu1 %v89_v5 }
  0x39   :  { %594 = vmatmul.mubr.f32.vlgmr.msra.gmra.mxu1 %v124_v7 }
  0xec   :  { %v130_v21 = vpop.f32.mrf.mxu0 }
  0xed   :  { %v131_v22 = vadd.f32 %v535_v20, %v130_v21  ;;  %v211_v24 = vpop.f32.mrf.mxu1 }
  0xee   :  { %v560_v23 = vpop.f32.mrf.mxu0 }
  0xef   :  { %v212_v25 = vadd.f32 %v211_v24, %v131_v22  ;;  %v567_v26 = vpop.f32.mrf.mxu1 }
  0xf0   :  { %v287_v27 = vpop.f32.mrf.mxu0 }
  0xf1   :  { %v288_v28 = vadd.f32 %v287_v27, %v212_v25 }
  0xf2   :  { %v574_v29 = vpop.f32.mrf.mxu0 }
  0xf3   :  { %v362_v30 = vpop.f32.mrf.mxu1 }
  0xf4   :  { %v363_v31 = vadd.f32 %v362_v30, %v288_v28 }
  0xf5   :  { %v581_v32 = vpop.f32.mrf.mxu1 }
  0xf6   :  { %v439_v33 = vpop.f32.mrf.mxu0 }
  0xf7   :  { %v440_v34 = vadd.f32 %v439_v33, %v363_v31 }
  0xf8   :  { %v588_v35 = vpop.f32.mrf.mxu0 }
  0xf9   :  { %v512_v36 = vpop.f32.mrf.mxu1 }
  0xfa   :  { %v513_v37 = vadd.f32 %v512_v36, %v440_v34 }
  0xfb   :  { %v595_v38 = vpop.f32.mrf.mxu1 }
  0xfc   :  { %516 = vst [vmem:[#allocation7] sm:$0xff] %v513_v37 }
  0xfd   :  { %521 = vsyncadd [#allocation4], 96  ;;  %s679_s2 = smov [#allocation7]  }
  0xfe   :  { %s522_s27 = sshll.u32 %s679_s2, 4  ;;  %s523_s27 = int_to_ptr.vmem [resolvable:$true] %s522_s27 }
  0xff   :  { %s645_s28 = scalar_lea.vmem %s523_s27, 32  ;;  %s649_s29 = scalar_lea.vmem %s523_s27, 128 }
 0x100   :  { %p646_p10 = scmp.ne.s32.totalorder %s523_s27, %s645_s28  ;;  %p650_p11 = scmp.lt.s32.totalorder %s523_s27, %s523_s27 }
 0x101   :  { %p651_p12 = scmp.lt.s32.totalorder %s649_s29, %s645_s28 }
 0x103   :  { %p652_p13 = por %p651_p12, %p650_p11 }
 0x105   :  { %p653_p0 = pnand %p652_p13, %p646_p10 }
 0x107   :  { %656 = shalt.err (!%p653_p0)
}
 0x108   :  { %528 = dma.vmem_to_hbm [thread:$0]  %s523_s27, 32, %s727_s3, [#allocation4], %s672_s16, %s672_s16, %s673_s17  }
 0x109   :  { %669 = dma.done.wait [#allocation4], 128  }
 0x10a   :  { %670 = vsyncadd [#allocation4], 4294967168 }
 0x10b   :  { %532 = vsyncpa [#allocation3], 1 }
 0x10c   :  { %533 = vsyncpa [#allocation6], 1 }
 0x10d   :  { %534 = vsyncpa [#allocation4], 1 }

</bundles_post_ra>
